<compile_context>
chip_gen: v5e
topology: v5e:2x2
jax: 0.10.0
libtpu: 0.0.40
codegen_flags: <defaults>
</compile_context>

<pallas_src>
import functools

import jax
import jax.numpy as jnp
from jax import lax
from jax.experimental import pallas as pl
from jax.experimental.pallas import tpu as pltpu

LN_EPS = 1e-5  # torch.nn.LayerNorm default


def _round_up(x, m):
    return ((x + m - 1) // m) * m


def nnlayer_kernel(x_ref, w_ref, b_ref, gamma_ref, beta_ref, out_ref, *, cast_to_bf16):
    # x_ref:     (TM, K)   row tile of flattened (T*B, input_size), f32
    # w_ref:     (K, H)    weight_ih (f32, or bf16 on the bf16-MXU path)
    # b_ref:     (1, H)    bias_ih
    # gamma_ref: (1, H)    LayerNorm weight
    # beta_ref:  (1, H)    LayerNorm bias
    # out_ref:   (TM, H)
    x = x_ref[...]
    if cast_to_bf16:
        # In-kernel VPU cast hides under MXU/DMA slack (no extra HBM pass).
        x = x.astype(jnp.bfloat16)

    # NNCell: igate = x @ W_ih + b_ih   (MXU matmul, f32 accumulate).
    igate = jnp.dot(x, w_ref[...], preferred_element_type=jnp.float32) + b_ref[...]

    # Two-pass LayerNorm statistics (subtract-mean form; XLU reductions are cheap).
    mean = jnp.mean(igate, axis=-1, keepdims=True)
    centered = igate - mean
    var = jnp.mean(centered * centered, axis=-1, keepdims=True)
    normed = centered * lax.rsqrt(var + LN_EPS) * gamma_ref[...] + beta_ref[...]

    # nonlinearity == 'relu'
    out_ref[...] = jnp.maximum(normed, 0.0).astype(out_ref.dtype)


def _choose_row_tile(M, per_row_bytes, fixed_bytes, vmem_budget):
    avail = max(vmem_budget - fixed_bytes, per_row_bytes * 8)
    tm = avail // per_row_bytes
    tm = min(tm, 2048)                      # diminishing returns past ~1-2K rows
    if M > 256:
        # Keep >= 2 grid steps so both v7x TensorCores get work.
        tm = min(tm, _round_up((M + 1) // 2, 128))
    if tm >= M:
        return M                            # single full-extent block (any M legal)
    if tm >= 256:
        tm = (tm // 256) * 256              # MXU-pass / lane-dense granularity
    elif tm >= 128:
        tm = 128
    else:
        tm = max(8, (tm // 8) * 8)          # sublane granularity floor
    return tm


def nnlayer_forward(x_tbk, weight_ih, bias_ih, ln_gamma, ln_beta,
                    *, use_bf16_matmul=None):
    """x_tbk: (T, B, K) float32 (batch_first=False, seq_idx=0).

    Returns (outputs (T, B, H), hstate (B, H)).
    """
    T, B, K = x_tbk.shape
    H = weight_ih.shape[1]
    M = T * B

    if use_bf16_matmul is None:
        # bf16-native MXU on v6e/v7x; only worth it once the matmul is sizable.
        use_bf16_matmul = (K >= 512 and H >= 512)

    x_bytes = 4                              # x stays f32 in HBM; cast is in-kernel
    w_bytes = 2 if use_bf16_matmul else 4

    # ---- generation-aware VMEM budget -------------------------------------
    try:
        vmem_cap = int(pltpu.get_tpu_info().vmem_capacity_bytes)
    except Exception:
        vmem_cap = 64 * 1024 * 1024          # conservative (v7x-sized) fallback
    vmem_budget = (vmem_cap * 3) // 4        # ~96 MiB on v5e/v6e, ~48 MiB on v7x

    # Fixed (grid-invariant) VMEM: weight + bias/gamma/beta.  Counted at 2
    # buffers so the non-Buffered(1) fallback path still fits.
    fixed_bytes = 2 * (K * H * w_bytes + 3 * H * 4)
    # Per-row VMEM: double-buffered x and out tiles + f32 igate/centered temps.
    per_row_bytes = 2 * K * x_bytes + 2 * H * 4 + 2 * H * 4

    tm = _choose_row_tile(M, per_row_bytes, fixed_bytes, vmem_budget)
    grid = (pl.cdiv(M, tm),)

    vmem_est = fixed_bytes + tm * per_row_bytes
    vmem_limit = min(vmem_cap, max(32 * 1024 * 1024, int(vmem_est * 1.5)))

    # TODO(synk): for very large weights (Buffered(1) weight > ~24 MiB, e.g.
    # K>=2048 with H>=4096 in f32 on v7x) add a trailing "arbitrary" K grid axis
    # with a (tm, H) f32 VMEM accumulator (init/finalize via pl.when).

    # ---- operands (no padding passes; reshape is free) --------------------
    x2d = x_tbk.reshape(M, K).astype(jnp.float32)
    w = weight_ih.astype(jnp.bfloat16 if use_bf16_matmul else jnp.float32)
    b = bias_ih.reshape(1, H).astype(jnp.float32)
    g = ln_gamma.reshape(1, H).astype(jnp.float32)
    bt = ln_beta.reshape(1, H).astype(jnp.float32)

    cost = pl.CostEstimate(
        flops=2 * M * K * H + 8 * M * H,
        transcendentals=M,                   # one rsqrt per row
        bytes_accessed=(M * K * x_bytes + K * H * w_bytes + 3 * H * 4 + M * H * 4),
    )

    kernel = functools.partial(nnlayer_kernel, cast_to_bf16=use_bf16_matmul)

    def build(single_buffer_invariants):
        inv_kw = ({"pipeline_mode": pl.Buffered(1)}
                  if single_buffer_invariants else {})
        return pl.pallas_call(
            kernel,
            out_shape=jax.ShapeDtypeStruct((M, H), jnp.float32),
            grid_spec=pl.GridSpec(
                grid=grid,
                in_specs=[
                    pl.BlockSpec((tm, K), lambda i: (i, 0)),           # pipelined rows
                    pl.BlockSpec((K, H), lambda i: (0, 0), **inv_kw),  # resident weight
                    pl.BlockSpec((1, H), lambda i: (0, 0), **inv_kw),  # bias
                    pl.BlockSpec((1, H), lambda i: (0, 0), **inv_kw),  # gamma
                    pl.BlockSpec((1, H), lambda i: (0, 0), **inv_kw),  # beta
                ],
                out_specs=pl.BlockSpec((tm, H), lambda i: (i, 0)),
            ),
            compiler_params=pltpu.CompilerParams(
                dimension_semantics=("parallel",),   # independent row tiles -> megacore
                vmem_limit_bytes=vmem_limit,
            ),
            cost_estimate=cost,
        )

    try:
        out2d = build(True)(x2d, w, b, g, bt)
    except Exception:
        # TODO(synk): drop this fallback once pl.Buffered(1) on grid-invariant
        # operands is confirmed across deployed JAX/Mosaic versions.
        out2d = build(False)(x2d, w, b, g, bt)

    outputs = out2d.reshape(T, B, H)
    hstate = outputs[-1]          # last timestep's (normalized, activated) state
    return outputs, hstate


def reference_forward(x_tbk, weight_ih, bias_ih, ln_gamma, ln_beta):
    igate = jnp.einsum("tbk,kh->tbh", x_tbk, weight_ih) + bias_ih
    mean = jnp.mean(igate, axis=-1, keepdims=True)
    var = jnp.mean((igate - mean) ** 2, axis=-1, keepdims=True)
    normed = (igate - mean) * lax.rsqrt(var + LN_EPS) * ln_gamma + ln_beta
    out = jnp.maximum(normed, 0.0)
    return out, out[-1]


if __name__ == "__main__":
    # Small, module-consistent shapes: seq=8, batch=2, input_size=16, hidden_size=32.
    T, B, K, H = 8, 2, 16, 32

    key = jax.random.PRNGKey(0)
    kx, kw = jax.random.split(key)

    x = jax.random.normal(kx, (T, B, K), dtype=jnp.float32)

    # NNCell init (c.NONLINEARITY == 'relu'): W_ih ~ N(0, sqrt(2/input_size)), bias = 0.
    weight_ih = jax.random.normal(kw, (K, H), dtype=jnp.float32) * jnp.sqrt(2.0 / K)
    bias_ih = jnp.zeros((H,), dtype=jnp.float32)
    # nn.LayerNorm(hidden_size) init: weight = 1, bias = 0.
    ln_gamma = jnp.ones((H,), dtype=jnp.float32)
    ln_beta = jnp.zeros((H,), dtype=jnp.float32)

    outputs, hstate = nnlayer_forward(x, weight_ih, bias_ih, ln_gamma, ln_beta)
    jax.block_until_ready(outputs)
    jax.block_until_ready(hstate)

    ref_out, ref_h = reference_forward(x, weight_ih, bias_ih, ln_gamma, ln_beta)
    assert outputs.shape == (T, B, H) and hstate.shape == (B, H)
    assert jnp.allclose(outputs, ref_out, atol=1e-4, rtol=1e-4)
    assert jnp.allclose(hstate, ref_h, atol=1e-4, rtol=1e-4)

    print("KERNEL_OK")
</pallas_src>

<mosaic_0001>
module attributes {stable_mosaic.version = 11 : i64} {
  func.func @nnlayer_kernel(%arg0: i32, %arg1: memref<16x16xf32, #tpu.memory_space<vmem>>, %arg2: memref<16x32xf32, #tpu.memory_space<vmem>>, %arg3: memref<1x32xf32, #tpu.memory_space<vmem>>, %arg4: memref<1x32xf32, #tpu.memory_space<vmem>>, %arg5: memref<1x32xf32, #tpu.memory_space<vmem>>, %arg6: memref<16x32xf32, #tpu.memory_space<vmem>>) attributes {dimension_semantics = [#tpu.dimension_semantics<parallel>], iteration_bounds = array<i64: 1>, scalar_prefetch = 0 : i64, scratch_operands = 0 : i64, tpu.core_type = #tpu.core_type<tc>, window_params = [{transform_indices = @transform_0, window_bounds = array<i64: 16, 16>}, {pipeline_mode = #tpu.pipeline_mode<synchronous>, transform_indices = @transform_1, window_bounds = array<i64: 16, 32>}, {pipeline_mode = #tpu.pipeline_mode<synchronous>, transform_indices = @transform_2, window_bounds = array<i64: 1, 32>}, {pipeline_mode = #tpu.pipeline_mode<synchronous>, transform_indices = @transform_3, window_bounds = array<i64: 1, 32>}, {pipeline_mode = #tpu.pipeline_mode<synchronous>, transform_indices = @transform_4, window_bounds = array<i64: 1, 32>}, {transform_indices = @transform_5, window_bounds = array<i64: 16, 32>}]} {
    %c0 = arith.constant 0 : index
    %c0_0 = arith.constant 0 : index
    %0 = vector.load %arg1[%c0, %c0_0] : memref<16x16xf32, #tpu.memory_space<vmem>>, vector<16x16xf32>
    %c0_1 = arith.constant 0 : index
    %c0_2 = arith.constant 0 : index
    %1 = vector.load %arg2[%c0_1, %c0_2] : memref<16x32xf32, #tpu.memory_space<vmem>>, vector<16x32xf32>
    %cst = arith.constant dense<0.000000e+00> : vector<16x32xf32>
    %2 = tpu.matmul %0, %1, %cst {dimension_numbers = #tpu.dot_dimension_numbers<[1], [0], [0], [1], [0, 0, 1, 1], [], []>} : vector<16x16xf32>, vector<16x32xf32>, vector<16x32xf32> -> vector<16x32xf32>
    %c0_3 = arith.constant 0 : index
    %c0_4 = arith.constant 0 : index
    %3 = vector.load %arg3[%c0_3, %c0_4] : memref<1x32xf32, #tpu.memory_space<vmem>>, vector<1x32xf32>
    %4 = vector.broadcast %3 : vector<1x32xf32> to vector<16x32xf32>
    %5 = arith.addf %2, %4 : vector<16x32xf32>
    %cst_5 = arith.constant dense<0.000000e+00> : vector<16xf32>
    %6 = vector.multi_reduction <add>, %5, %cst_5 [1] : vector<16x32xf32> to vector<16xf32>
    %7 = vector.shape_cast %6 : vector<16xf32> to vector<16x1xf32>
    %cst_6 = arith.constant 3.200000e+01 : f32
    %8 = vector.broadcast %cst_6 : f32 to vector<16x1xf32>
    %9 = arith.divf %7, %8 : vector<16x1xf32>
    %10 = vector.broadcast %9 : vector<16x1xf32> to vector<16x32xf32>
    %11 = arith.subf %5, %10 : vector<16x32xf32>
    %12 = arith.mulf %11, %11 : vector<16x32xf32>
    %cst_7 = arith.constant dense<0.000000e+00> : vector<16xf32>
    %13 = vector.multi_reduction <add>, %12, %cst_7 [1] : vector<16x32xf32> to vector<16xf32>
    %14 = vector.shape_cast %13 : vector<16xf32> to vector<16x1xf32>
    %cst_8 = arith.constant 3.200000e+01 : f32
    %15 = vector.broadcast %cst_8 : f32 to vector<16x1xf32>
    %16 = arith.divf %14, %15 : vector<16x1xf32>
    %cst_9 = arith.constant 9.99999974E-6 : f32
    %17 = vector.broadcast %cst_9 : f32 to vector<16x1xf32>
    %18 = arith.addf %16, %17 : vector<16x1xf32>
    %19 = math.rsqrt %18 : vector<16x1xf32>
    %20 = vector.broadcast %19 : vector<16x1xf32> to vector<16x32xf32>
    %21 = arith.mulf %11, %20 : vector<16x32xf32>
    %c0_10 = arith.constant 0 : index
    %c0_11 = arith.constant 0 : index
    %22 = vector.load %arg4[%c0_10, %c0_11] : memref<1x32xf32, #tpu.memory_space<vmem>>, vector<1x32xf32>
    %23 = vector.broadcast %22 : vector<1x32xf32> to vector<16x32xf32>
    %24 = arith.mulf %21, %23 : vector<16x32xf32>
    %c0_12 = arith.constant 0 : index
    %c0_13 = arith.constant 0 : index
    %25 = vector.load %arg5[%c0_12, %c0_13] : memref<1x32xf32, #tpu.memory_space<vmem>>, vector<1x32xf32>
    %26 = vector.broadcast %25 : vector<1x32xf32> to vector<16x32xf32>
    %27 = arith.addf %24, %26 : vector<16x32xf32>
    %cst_14 = arith.constant 0.000000e+00 : f32
    %28 = vector.broadcast %cst_14 : f32 to vector<16x32xf32>
    %29 = arith.maximumf %27, %28 : vector<16x32xf32>
    %c0_15 = arith.constant 0 : index
    %c0_16 = arith.constant 0 : index
    %30 = vector.load %arg6[%c0_15, %c0_16] : memref<16x32xf32, #tpu.memory_space<vmem>>, vector<16x32xf32>
    tpu.vector_store %arg6[%c0_15, %c0_16], %29 {strides = array<i32>} : memref<16x32xf32, #tpu.memory_space<vmem>>, vector<16x32xf32>,
    return
  }
  func.func @transform_0(%arg0: i32) -> (i32, i32) {
    %c0_i32 = arith.constant 0 : i32
    %c0_i32_0 = arith.constant 0 : i32
    return %arg0, %c0_i32 : i32, i32
  }
  func.func @transform_1(%arg0: i32) -> (i32, i32) {
    %c0_i32 = arith.constant 0 : i32
    %c0_i32_0 = arith.constant 0 : i32
    %c0_i32_1 = arith.constant 0 : i32
    return %c0_i32, %c0_i32_0 : i32, i32
  }
  func.func @transform_2(%arg0: i32) -> (i32, i32) {
    %c0_i32 = arith.constant 0 : i32
    %c0_i32_0 = arith.constant 0 : i32
    %c0_i32_1 = arith.constant 0 : i32
    return %c0_i32, %c0_i32_0 : i32, i32
  }
  func.func @transform_3(%arg0: i32) -> (i32, i32) {
    %c0_i32 = arith.constant 0 : i32
    %c0_i32_0 = arith.constant 0 : i32
    %c0_i32_1 = arith.constant 0 : i32
    return %c0_i32, %c0_i32_0 : i32, i32
  }
  func.func @transform_4(%arg0: i32) -> (i32, i32) {
    %c0_i32 = arith.constant 0 : i32
    %c0_i32_0 = arith.constant 0 : i32
    %c0_i32_1 = arith.constant 0 : i32
    return %c0_i32, %c0_i32_0 : i32, i32
  }
  func.func @transform_5(%arg0: i32) -> (i32, i32) {
    %c0_i32 = arith.constant 0 : i32
    %c0_i32_0 = arith.constant 0 : i32
    return %arg0, %c0_i32 : i32, i32
  }
}

module attributes {stable_mosaic.version = 11 : i64} {
  func.func @nnlayer_kernel(%arg0: i32, %arg1: memref<16x16xf32, #tpu.memory_space<vmem>>, %arg2: memref<16x32xf32, #tpu.memory_space<vmem>>, %arg3: memref<1x32xf32, #tpu.memory_space<vmem>>, %arg4: memref<1x32xf32, #tpu.memory_space<vmem>>, %arg5: memref<1x32xf32, #tpu.memory_space<vmem>>, %arg6: memref<16x32xf32, #tpu.memory_space<vmem>>) attributes {dimension_semantics = [#tpu.dimension_semantics<parallel>], iteration_bounds = array<i64: 1>, scalar_prefetch = 0 : i64, scratch_operands = 0 : i64, tpu.core_type = #tpu.core_type<tc>, window_params = [{transform_indices = @transform_0, window_bounds = array<i64: 16, 16>}, {pipeline_mode = #tpu.pipeline_mode<synchronous>, transform_indices = @transform_1, window_bounds = array<i64: 16, 32>}, {pipeline_mode = #tpu.pipeline_mode<synchronous>, transform_indices = @transform_2, window_bounds = array<i64: 1, 32>}, {pipeline_mode = #tpu.pipeline_mode<synchronous>, transform_indices = @transform_3, window_bounds = array<i64: 1, 32>}, {pipeline_mode = #tpu.pipeline_mode<synchronous>, transform_indices = @transform_4, window_bounds = array<i64: 1, 32>}, {transform_indices = @transform_5, window_bounds = array<i64: 16, 32>}]} {
    %c0 = arith.constant 0 : index
    %c0_0 = arith.constant 0 : index
    %0 = vector.load %arg1[%c0, %c0_0] : memref<16x16xf32, #tpu.memory_space<vmem>>, vector<16x16xf32>
    %c0_1 = arith.constant 0 : index
    %c0_2 = arith.constant 0 : index
    %1 = vector.load %arg2[%c0_1, %c0_2] : memref<16x32xf32, #tpu.memory_space<vmem>>, vector<16x32xf32>
    %cst = arith.constant dense<0.000000e+00> : vector<16x32xf32>
    %2 = tpu.matmul %0, %1, %cst {dimension_numbers = #tpu.dot_dimension_numbers<[1], [0], [0], [1], [0, 0, 1, 1], [], []>} : vector<16x16xf32>, vector<16x32xf32>, vector<16x32xf32> -> vector<16x32xf32>
    %c0_3 = arith.constant 0 : index
    %c0_4 = arith.constant 0 : index
    %3 = vector.load %arg3[%c0_3, %c0_4] : memref<1x32xf32, #tpu.memory_space<vmem>>, vector<1x32xf32>
    %4 = vector.broadcast %3 : vector<1x32xf32> to vector<16x32xf32>
    %5 = arith.addf %2, %4 : vector<16x32xf32>
    %cst_5 = arith.constant dense<0.000000e+00> : vector<16xf32>
    %6 = vector.multi_reduction <add>, %5, %cst_5 [1] : vector<16x32xf32> to vector<16xf32>
    %7 = vector.shape_cast %6 : vector<16xf32> to vector<16x1xf32>
    %cst_6 = arith.constant 3.200000e+01 : f32
    %8 = vector.broadcast %cst_6 : f32 to vector<16x1xf32>
    %9 = arith.divf %7, %8 : vector<16x1xf32>
    %10 = vector.broadcast %9 : vector<16x1xf32> to vector<16x32xf32>
    %11 = arith.subf %5, %10 : vector<16x32xf32>
    %12 = arith.mulf %11, %11 : vector<16x32xf32>
    %cst_7 = arith.constant dense<0.000000e+00> : vector<16xf32>
    %13 = vector.multi_reduction <add>, %12, %cst_7 [1] : vector<16x32xf32> to vector<16xf32>
    %14 = vector.shape_cast %13 : vector<16xf32> to vector<16x1xf32>
    %cst_8 = arith.constant 3.200000e+01 : f32
    %15 = vector.broadcast %cst_8 : f32 to vector<16x1xf32>
    %16 = arith.divf %14, %15 : vector<16x1xf32>
    %cst_9 = arith.constant 9.99999974E-6 : f32
    %17 = vector.broadcast %cst_9 : f32 to vector<16x1xf32>
    %18 = arith.addf %16, %17 : vector<16x1xf32>
    %19 = math.rsqrt %18 : vector<16x1xf32>
    %20 = vector.broadcast %19 : vector<16x1xf32> to vector<16x32xf32>
    %21 = arith.mulf %11, %20 : vector<16x32xf32>
    %c0_10 = arith.constant 0 : index
    %c0_11 = arith.constant 0 : index
    %22 = vector.load %arg4[%c0_10, %c0_11] : memref<1x32xf32, #tpu.memory_space<vmem>>, vector<1x32xf32>
    %23 = vector.broadcast %22 : vector<1x32xf32> to vector<16x32xf32>
    %24 = arith.mulf %21, %23 : vector<16x32xf32>
    %c0_12 = arith.constant 0 : index
    %c0_13 = arith.constant 0 : index
    %25 = vector.load %arg5[%c0_12, %c0_13] : memref<1x32xf32, #tpu.memory_space<vmem>>, vector<1x32xf32>
    %26 = vector.broadcast %25 : vector<1x32xf32> to vector<16x32xf32>
    %27 = arith.addf %24, %26 : vector<16x32xf32>
    %cst_14 = arith.constant 0.000000e+00 : f32
    %28 = vector.broadcast %cst_14 : f32 to vector<16x32xf32>
    %29 = arith.maximumf %27, %28 : vector<16x32xf32>
    %c0_15 = arith.constant 0 : index
    %c0_16 = arith.constant 0 : index
    %30 = vector.load %arg6[%c0_15, %c0_16] : memref<16x32xf32, #tpu.memory_space<vmem>>, vector<16x32xf32>
    tpu.vector_store %arg6[%c0_15, %c0_16], %29 {strides = array<i32>} : memref<16x32xf32, #tpu.memory_space<vmem>>, vector<16x32xf32>,
    return
  }
  func.func @transform_0(%arg0: i32) -> (i32, i32) {
    %c0_i32 = arith.constant 0 : i32
    %c0_i32_0 = arith.constant 0 : i32
    return %arg0, %c0_i32 : i32, i32
  }
  func.func @transform_1(%arg0: i32) -> (i32, i32) {
    %c0_i32 = arith.constant 0 : i32
    %c0_i32_0 = arith.constant 0 : i32
    %c0_i32_1 = arith.constant 0 : i32
    return %c0_i32, %c0_i32_0 : i32, i32
  }
  func.func @transform_2(%arg0: i32) -> (i32, i32) {
    %c0_i32 = arith.constant 0 : i32
    %c0_i32_0 = arith.constant 0 : i32
    %c0_i32_1 = arith.constant 0 : i32
    return %c0_i32, %c0_i32_0 : i32, i32
  }
  func.func @transform_3(%arg0: i32) -> (i32, i32) {
    %c0_i32 = arith.constant 0 : i32
    %c0_i32_0 = arith.constant 0 : i32
    %c0_i32_1 = arith.constant 0 : i32
    return %c0_i32, %c0_i32_0 : i32, i32
  }
  func.func @transform_4(%arg0: i32) -> (i32, i32) {
    %c0_i32 = arith.constant 0 : i32
    %c0_i32_0 = arith.constant 0 : i32
    %c0_i32_1 = arith.constant 0 : i32
    return %c0_i32, %c0_i32_0 : i32, i32
  }
  func.func @transform_5(%arg0: i32) -> (i32, i32) {
    %c0_i32 = arith.constant 0 : i32
    %c0_i32_0 = arith.constant 0 : i32
    return %arg0, %c0_i32 : i32, i32
  }
}

</mosaic_0001>

<bundles_post_ra>
// kernel: tpu_custom_call.1
= control target key start
LH: loop header
LB: loop body
LE: loop exit
PB: predicated region body
PF: predicated region fallthrough
CT: control target
= control target key end

     0   :  { %10 = vsyncpa [#allocation3], 0  ;;  %s345_s0 = inlined_call_operand.hbm [shape: f32[16,16], index: 0, kind: input, shape index: {}]   ;;  %s346_s1 = inlined_call_operand.hbm [shape: f32[16,32], index: 1, kind: input, shape index: {}]   ;;  %s347_s2 = inlined_call_operand.vmem [shape: f32[1,32], index: 2, kind: input, shape index: {}]   ;;  %s348_s3 = inlined_call_operand.vmem [shape: f32[1,32], index: 3, kind: input, shape index: {}]   ;;  %s349_s4 = inlined_call_operand.vmem [shape: f32[1,32], index: 4, kind: input, shape index: {}]   ;;  %s350_s5 = inlined_call_operand.hbm [shape: f32[16,32], index: 5, kind: output, shape index: {}]  }
   0x1   :  { %11 = vsyncpa [#allocation6], 0 }
   0x2   :  { %12 = vsyncpa [#allocation4], 0  ;;  %s17_s20 = sshll.u32 %s345_s0, 4  ;;  %s276_s21 = smov [#allocation2]   ;;  %s18_s20 = int_to_ptr.hbm [resolvable:$true] %s17_s20 }
   0x3   :  { %s19_s22 = sshll.u32 %s276_s21, 4  ;;  %s30_s25 = sshll.u32 %s346_s1, 4  ;;  %s20_s22 = int_to_ptr.vmem [resolvable:$true] %s19_s22  ;;  %s31_s25 = int_to_ptr.hbm [resolvable:$true] %s30_s25 }
   0x4   :  { %s277_s26 = smov 128   ;;  %s278_s27 = smov 8  }
   0x5   :  { %25 = dma.hbm_to_vmem [thread:$0]  %s18_s20, 256, %s20_s22, [#allocation3], %s277_s26, %s277_s26, %s278_s27  }
   0x6   :  { %s279_s28 = smov [#allocation5]  }
   0x7   :  { %s32_s29 = sshll.u32 %s279_s28, 4  ;;  %s33_s29 = int_to_ptr.vmem [resolvable:$true] %s32_s29 }
   0x8   :  { %38 = dma.hbm_to_vmem [thread:$0]  %s31_s25, 256, %s33_s29, [#allocation6], %s277_s26, %s277_s26, %s278_s27  }
   0x9   :  { %270 = dma.done.wait [#allocation3], 256  }
   0xa   :  { %271 = vsyncadd [#allocation3], 4294967040 }
   0xb   :  { %272 = dma.done.wait [#allocation6], 256  }
   0xc   :  { %273 = vsyncadd [#allocation6], 4294967040  ;;  %v56_v0 = vld [vmem:[#allocation5 + $0x8] sm:$0xff]  ;;  %v55_v1 = vld [vmem:[#allocation5] sm:$0xff]  ;;  %vm61_vm0 = vcmask 130048   ;;  %vm91_vm1 = vcmask 261120  }
   0xd   :  { %82 = vmatpush.msra.mxu0 %v56_v0  ;;  %v53_v2 = vld [vmem:[#allocation2] sm:$0xff]  ;;  %181 = vmatpush.msra.mxu1 %v56_v0  ;;  %v54_v3 = vld [vmem:[#allocation2 + $0x8] sm:$0xff]  ;;  %v280_v11 = vmov 32.0  }
   0xe   :  { %v189_v4 = vld [vmem:[%s347_s2] ss:$0 sm:$0xff]  ;;  %192 = vrcp.f32 %v280_v11 }
   0xf   :  { %83 = vmatpush.msra.mxu0 %v55_v1  ;;  %182 = vmatpush.msra.mxu1 %v55_v1  ;;  %v190_v42 = vld [vmem:[%s348_s3] ss:$0 sm:$0xff]  ;;  %s281_s3 = smov [#allocation7]  }
  0x10   :  { %179 = vmatmul.msk.f32.vlgmr.msra.gmra.mxu0 %vm61_vm0, %v53_v2  ;;  %180 = vmatmul.msk.f32.vlgmr.msra.gmra.mxu1 %vm61_vm0, %v54_v3  ;;  %v191_v46 = vld [vmem:[%s349_s4] ss:$0 sm:$0xff]  ;;  %s163_s8 = sshll.u32 %s281_s3, 4  ;;  %s165_s4 = sshll.u32 %s350_s5, 4  ;;  %s164_s8 = int_to_ptr.vmem [resolvable:$true] %s163_s8  ;;  %s166_s4 = int_to_ptr.hbm [resolvable:$true] %s165_s4 }
  0x14   :  { %v193_v12 = vpop.eup %192 }
  0x15   :  { %v99_v13 = vmul.f32 32.0, %v193_v12  ;;  %vm103_vm2 = vweird.f32 %v193_v12 }
  0x17   :  { %v100_v14 = vsub.f32 1.0, %v99_v13 }
  0x19   :  { %v101_v15 = vmul.f32 %v193_v12, %v100_v14 }
  0x1b   :  { %v102_v16 = vadd.f32 %v193_v12, %v101_v15 }
  0x1d   :  { %v104_v17 = vsel %vm103_vm2, %v193_v12, %v102_v16 }
  0x8d   :  { %v85_v5 = vpop.f32.mrf.mxu0  ;;  %v88_v7 = vpop.f32.mrf.mxu1 }
  0x8e   :  { %v86_v6 = vadd.f32 %v189_v4, %v85_v5  ;;  %v89_v9 = vadd.f32 %v189_v4, %v88_v7 }
  0x90   :  { %v92_v8 = vsel %vm91_vm1, %v86_v6, 0.0  ;;  %v95_v10 = vsel %vm91_vm1, %v89_v9, 0.0 }
  0x91   :  { %93 = vadd.xlane.f32.xlu0 %v92_v8 }
  0x99   :  { %96 = vadd.xlane.f32.xlu0 %v95_v10 }
 0x104   :  { %v94_v18 = vpop.xlane.xlu0 %93 }
 0x105   :  { %v105_v19 = vmul.f32 %v104_v17, %v94_v18 }
 0x107   :  { %v107_v20 = vsub.f32 %v86_v6, %v105_v19 }
 0x109   :  { %v109_v21 = vmul.f32 %v107_v20, %v107_v20 }
 0x10b   :  { %v111_v22 = vsel %vm91_vm1, %v109_v21, 0.0 }
 0x10c   :  { %112 = vadd.xlane.f32.xlu1 %v111_v22  ;;  %v97_v23 = vpop.xlane.xlu0 %96 }
 0x10d   :  { %v106_v24 = vmul.f32 %v104_v17, %v97_v23 }
 0x10f   :  { %v108_v25 = vsub.f32 %v89_v9, %v106_v24 }
 0x111   :  { %v110_v26 = vmul.f32 %v108_v25, %v108_v25 }
 0x113   :  { %v114_v27 = vsel %vm91_vm1, %v110_v26, 0.0 }
 0x114   :  { %115 = vadd.xlane.f32.xlu1 %v114_v27 }
 0x17f   :  { %v113_v28 = vpop.xlane.xlu1 %112 }
 0x180   :  { %v117_v29 = vmul.f32 %v113_v28, %v104_v17 }
 0x182   :  { %v119_v30 = vadd.f32 1e-05, %v117_v29 }
 0x184   :  { %194 = vrsqrt.f32 %v119_v30  ;;  %vm127_vm4 = vweird.f32 %v119_v30 }
 0x187   :  { %v116_v31 = vpop.xlane.xlu1 %115 }
 0x188   :  { %v118_v32 = vmul.f32 %v116_v31, %v104_v17 }
 0x18a   :  { %v195_v33 = vpop.eup %194  ;;  %v120_v34 = vadd.f32 1e-05, %v118_v32 }
 0x18b   :  { %v122_v35 = vmul.f32 %v195_v33, %v119_v30  ;;  %vm128_vm3 = vweird.f32 %v195_v33 }
 0x18c   :  { %196 = vrsqrt.f32 %v120_v34  ;;  %vm129_vm5 = vmor %vm127_vm4, %vm128_vm3  ;;  %vm137_vm7 = vweird.f32 %v120_v34 }
 0x18d   :  { %v123_v36 = vmul.f32 %v195_v33, %v122_v35 }
 0x18f   :  { %v124_v37 = vmul.f32 0.5, %v123_v36 }
 0x191   :  { %v125_v38 = vsub.f32 1.5, %v124_v37 }
 0x192   :  { %v197_v39 = vpop.eup %196 }
 0x193   :  { %v126_v40 = vmul.f32 %v195_v33, %v125_v38  ;;  %v132_v41 = vmul.f32 %v197_v39, %v120_v34  ;;  %vm138_vm6 = vweird.f32 %v197_v39 }
 0x194   :  { %vm139_vm8 = vmor %vm137_vm7, %vm138_vm6 }
 0x195   :  { %v130_v43 = vsel %vm129_vm5, %v195_v33, %v126_v40  ;;  %v133_v44 = vmul.f32 %v197_v39, %v132_v41 }
 0x196   :  { %v141_v45 = vmul.f32 %v130_v43, %v107_v20 }
 0x197   :  { %v134_v47 = vmul.f32 0.5, %v133_v44 }
 0x198   :  { %v147_v48 = vmul.f32 %v190_v42, %v141_v45 }
 0x199   :  { %v135_v49 = vsub.f32 1.5, %v134_v47 }
 0x19a   :  { %v153_v50 = vadd.f32 %v191_v46, %v147_v48 }
 0x19b   :  { %v136_v51 = vmul.f32 %v197_v39, %v135_v49 }
 0x19c   :  { %v155_v52 = vmax.f32 %v153_v50, 0.0 }
 0x19d   :  { %v140_v53 = vsel %vm139_vm8, %v197_v39, %v136_v51 }
 0x19e   :  { %v142_v54 = vmul.f32 %v140_v53, %v108_v25  ;;  %157 = vst.msk [vmem:[#allocation7] sm:$0xff] %vm91_vm1, %v155_v52 }
 0x1a0   :  { %v148_v55 = vmul.f32 %v190_v42, %v142_v54 }
 0x1a2   :  { %v154_v56 = vadd.f32 %v191_v46, %v148_v55 }
 0x1a4   :  { %v156_v57 = vmax.f32 %v154_v56, 0.0 }
 0x1a6   :  { %158 = vst.msk [vmem:[#allocation7 + $0x8] sm:$0xff] %vm91_vm1, %v156_v57 }
 0x1a7   :  { %171 = dma.vmem_to_hbm [thread:$0]  %s164_s8, 256, %s166_s4, [#allocation4], %s277_s26, %s277_s26, %s278_s27  }
 0x1a8   :  { %274 = dma.done.wait [#allocation4], 256  }
 0x1a9   :  { %275 = vsyncadd [#allocation4], 4294967040 }
 0x1aa   :  { %176 = vsyncpa [#allocation3], 1 }
 0x1ab   :  { %177 = vsyncpa [#allocation6], 1 }
 0x1ac   :  { %178 = vsyncpa [#allocation4], 1 }

// kernel: tpu_custom_call.1
= control target key start
LH: loop header
LB: loop body
LE: loop exit
PB: predicated region body
PF: predicated region fallthrough
CT: control target
= control target key end

     0   :  { %10 = vsyncpa [#allocation3], 0  ;;  %s345_s0 = inlined_call_operand.hbm [shape: f32[16,16], index: 0, kind: input, shape index: {}]   ;;  %s346_s1 = inlined_call_operand.hbm [shape: f32[16,32], index: 1, kind: input, shape index: {}]   ;;  %s347_s2 = inlined_call_operand.vmem [shape: f32[1,32], index: 2, kind: input, shape index: {}]   ;;  %s348_s3 = inlined_call_operand.vmem [shape: f32[1,32], index: 3, kind: input, shape index: {}]   ;;  %s349_s4 = inlined_call_operand.vmem [shape: f32[1,32], index: 4, kind: input, shape index: {}]   ;;  %s350_s5 = inlined_call_operand.hbm [shape: f32[16,32], index: 5, kind: output, shape index: {}]  }
   0x1   :  { %11 = vsyncpa [#allocation6], 0 }
   0x2   :  { %12 = vsyncpa [#allocation4], 0  ;;  %s17_s20 = sshll.u32 %s345_s0, 4  ;;  %s276_s21 = smov [#allocation2]   ;;  %s18_s20 = int_to_ptr.hbm [resolvable:$true] %s17_s20 }
   0x3   :  { %s19_s22 = sshll.u32 %s276_s21, 4  ;;  %s30_s25 = sshll.u32 %s346_s1, 4  ;;  %s20_s22 = int_to_ptr.vmem [resolvable:$true] %s19_s22  ;;  %s31_s25 = int_to_ptr.hbm [resolvable:$true] %s30_s25 }
   0x4   :  { %s277_s26 = smov 128   ;;  %s278_s27 = smov 8  }
   0x5   :  { %25 = dma.hbm_to_vmem [thread:$0]  %s18_s20, 256, %s20_s22, [#allocation3], %s277_s26, %s277_s26, %s278_s27  }
   0x6   :  { %s279_s28 = smov [#allocation5]  }
   0x7   :  { %s32_s29 = sshll.u32 %s279_s28, 4  ;;  %s33_s29 = int_to_ptr.vmem [resolvable:$true] %s32_s29 }
   0x8   :  { %38 = dma.hbm_to_vmem [thread:$0]  %s31_s25, 256, %s33_s29, [#allocation6], %s277_s26, %s277_s26, %s278_s27  }
   0x9   :  { %270 = dma.done.wait [#allocation3], 256  }
   0xa   :  { %271 = vsyncadd [#allocation3], 4294967040 }
   0xb   :  { %272 = dma.done.wait [#allocation6], 256  }
   0xc   :  { %273 = vsyncadd [#allocation6], 4294967040  ;;  %v56_v0 = vld [vmem:[#allocation5 + $0x8] sm:$0xff]  ;;  %v55_v1 = vld [vmem:[#allocation5] sm:$0xff]  ;;  %vm61_vm0 = vcmask 130048   ;;  %vm91_vm1 = vcmask 261120  }
   0xd   :  { %82 = vmatpush.msra.mxu0 %v56_v0  ;;  %v53_v2 = vld [vmem:[#allocation2] sm:$0xff]  ;;  %181 = vmatpush.msra.mxu1 %v56_v0  ;;  %v54_v3 = vld [vmem:[#allocation2 + $0x8] sm:$0xff]  ;;  %v280_v11 = vmov 32.0  }
   0xe   :  { %v189_v4 = vld [vmem:[%s347_s2] ss:$0 sm:$0xff]  ;;  %192 = vrcp.f32 %v280_v11 }
   0xf   :  { %83 = vmatpush.msra.mxu0 %v55_v1  ;;  %182 = vmatpush.msra.mxu1 %v55_v1  ;;  %v190_v42 = vld [vmem:[%s348_s3] ss:$0 sm:$0xff]  ;;  %s281_s3 = smov [#allocation7]  }
  0x10   :  { %179 = vmatmul.msk.f32.vlgmr.msra.gmra.mxu0 %vm61_vm0, %v53_v2  ;;  %180 = vmatmul.msk.f32.vlgmr.msra.gmra.mxu1 %vm61_vm0, %v54_v3  ;;  %v191_v46 = vld [vmem:[%s349_s4] ss:$0 sm:$0xff]  ;;  %s163_s8 = sshll.u32 %s281_s3, 4  ;;  %s165_s4 = sshll.u32 %s350_s5, 4  ;;  %s164_s8 = int_to_ptr.vmem [resolvable:$true] %s163_s8  ;;  %s166_s4 = int_to_ptr.hbm [resolvable:$true] %s165_s4 }
  0x14   :  { %v193_v12 = vpop.eup %192 }
  0x15   :  { %v99_v13 = vmul.f32 32.0, %v193_v12  ;;  %vm103_vm2 = vweird.f32 %v193_v12 }
  0x17   :  { %v100_v14 = vsub.f32 1.0, %v99_v13 }
  0x19   :  { %v101_v15 = vmul.f32 %v193_v12, %v100_v14 }
  0x1b   :  { %v102_v16 = vadd.f32 %v193_v12, %v101_v15 }
  0x1d   :  { %v104_v17 = vsel %vm103_vm2, %v193_v12, %v102_v16 }
  0x8d   :  { %v85_v5 = vpop.f32.mrf.mxu0  ;;  %v88_v7 = vpop.f32.mrf.mxu1 }
  0x8e   :  { %v86_v6 = vadd.f32 %v189_v4, %v85_v5  ;;  %v89_v9 = vadd.f32 %v189_v4, %v88_v7 }
  0x90   :  { %v92_v8 = vsel %vm91_vm1, %v86_v6, 0.0  ;;  %v95_v10 = vsel %vm91_vm1, %v89_v9, 0.0 }
  0x91   :  { %93 = vadd.xlane.f32.xlu0 %v92_v8 }
  0x99   :  { %96 = vadd.xlane.f32.xlu0 %v95_v10 }
 0x104   :  { %v94_v18 = vpop.xlane.xlu0 %93 }
 0x105   :  { %v105_v19 = vmul.f32 %v104_v17, %v94_v18 }
 0x107   :  { %v107_v20 = vsub.f32 %v86_v6, %v105_v19 }
 0x109   :  { %v109_v21 = vmul.f32 %v107_v20, %v107_v20 }
 0x10b   :  { %v111_v22 = vsel %vm91_vm1, %v109_v21, 0.0 }
 0x10c   :  { %112 = vadd.xlane.f32.xlu1 %v111_v22  ;;  %v97_v23 = vpop.xlane.xlu0 %96 }
 0x10d   :  { %v106_v24 = vmul.f32 %v104_v17, %v97_v23 }
 0x10f   :  { %v108_v25 = vsub.f32 %v89_v9, %v106_v24 }
 0x111   :  { %v110_v26 = vmul.f32 %v108_v25, %v108_v25 }
 0x113   :  { %v114_v27 = vsel %vm91_vm1, %v110_v26, 0.0 }
 0x114   :  { %115 = vadd.xlane.f32.xlu1 %v114_v27 }
 0x17f   :  { %v113_v28 = vpop.xlane.xlu1 %112 }
 0x180   :  { %v117_v29 = vmul.f32 %v113_v28, %v104_v17 }
 0x182   :  { %v119_v30 = vadd.f32 1e-05, %v117_v29 }
 0x184   :  { %194 = vrsqrt.f32 %v119_v30  ;;  %vm127_vm4 = vweird.f32 %v119_v30 }
 0x187   :  { %v116_v31 = vpop.xlane.xlu1 %115 }
 0x188   :  { %v118_v32 = vmul.f32 %v116_v31, %v104_v17 }
 0x18a   :  { %v195_v33 = vpop.eup %194  ;;  %v120_v34 = vadd.f32 1e-05, %v118_v32 }
 0x18b   :  { %v122_v35 = vmul.f32 %v195_v33, %v119_v30  ;;  %vm128_vm3 = vweird.f32 %v195_v33 }
 0x18c   :  { %196 = vrsqrt.f32 %v120_v34  ;;  %vm129_vm5 = vmor %vm127_vm4, %vm128_vm3  ;;  %vm137_vm7 = vweird.f32 %v120_v34 }
 0x18d   :  { %v123_v36 = vmul.f32 %v195_v33, %v122_v35 }
 0x18f   :  { %v124_v37 = vmul.f32 0.5, %v123_v36 }
 0x191   :  { %v125_v38 = vsub.f32 1.5, %v124_v37 }
 0x192   :  { %v197_v39 = vpop.eup %196 }
 0x193   :  { %v126_v40 = vmul.f32 %v195_v33, %v125_v38  ;;  %v132_v41 = vmul.f32 %v197_v39, %v120_v34  ;;  %vm138_vm6 = vweird.f32 %v197_v39 }
 0x194   :  { %vm139_vm8 = vmor %vm137_vm7, %vm138_vm6 }
 0x195   :  { %v130_v43 = vsel %vm129_vm5, %v195_v33, %v126_v40  ;;  %v133_v44 = vmul.f32 %v197_v39, %v132_v41 }
 0x196   :  { %v141_v45 = vmul.f32 %v130_v43, %v107_v20 }
 0x197   :  { %v134_v47 = vmul.f32 0.5, %v133_v44 }
 0x198   :  { %v147_v48 = vmul.f32 %v190_v42, %v141_v45 }
 0x199   :  { %v135_v49 = vsub.f32 1.5, %v134_v47 }
 0x19a   :  { %v153_v50 = vadd.f32 %v191_v46, %v147_v48 }
 0x19b   :  { %v136_v51 = vmul.f32 %v197_v39, %v135_v49 }
 0x19c   :  { %v155_v52 = vmax.f32 %v153_v50, 0.0 }
 0x19d   :  { %v140_v53 = vsel %vm139_vm8, %v197_v39, %v136_v51 }
 0x19e   :  { %v142_v54 = vmul.f32 %v140_v53, %v108_v25  ;;  %157 = vst.msk [vmem:[#allocation7] sm:$0xff] %vm91_vm1, %v155_v52 }
 0x1a0   :  { %v148_v55 = vmul.f32 %v190_v42, %v142_v54 }
 0x1a2   :  { %v154_v56 = vadd.f32 %v191_v46, %v148_v55 }
 0x1a4   :  { %v156_v57 = vmax.f32 %v154_v56, 0.0 }
 0x1a6   :  { %158 = vst.msk [vmem:[#allocation7 + $0x8] sm:$0xff] %vm91_vm1, %v156_v57 }
 0x1a7   :  { %171 = dma.vmem_to_hbm [thread:$0]  %s164_s8, 256, %s166_s4, [#allocation4], %s277_s26, %s277_s26, %s278_s27  }
 0x1a8   :  { %274 = dma.done.wait [#allocation4], 256  }
 0x1a9   :  { %275 = vsyncadd [#allocation4], 4294967040 }
 0x1aa   :  { %176 = vsyncpa [#allocation3], 1 }
 0x1ab   :  { %177 = vsyncpa [#allocation6], 1 }
 0x1ac   :  { %178 = vsyncpa [#allocation4], 1 }

</bundles_post_ra>
